<compile_context>
chip_gen: v7x
topology: tpu7x:2x2x1
jax: 0.10.0
libtpu: 0.0.40
codegen_flags: <defaults>
</compile_context>

<pallas_src>
import functools

import jax
import jax.numpy as jnp
from jax.experimental import pallas as pl
from jax.experimental.pallas import tpu as pltpu

HIDDEN = 4  # nn.GRU(4, 4)
INPUT = 4


def _gru_last_kernel(x_ref, p_ref, out_ref, *, last_off):
    """Single GRU-cell step (h0 = 0) on the last observation row.

    x_ref   : SMEM (N*I,)     f32 — flattened intruder observations (scalar reads)
    p_ref   : VMEM (I+2, 3, H) f32 — packed params:
                p[0:I]  = weight_ih re-laid as (I, 3, H), gate order [r|z|n]
                p[I]    = [b_ir+b_hr, b_iz+b_hz, b_in]          (3, H)
                p[I+1]  = b_hn in gate-row 2, zeros elsewhere    (3, H)
    out_ref : VMEM (1, H)     f32 — h' = (1 - z) * n
    """
    n_in = p_ref.shape[0] - 2

    # Gate pre-activations g[gate, j] = bias[gate, j] + sum_k x[k] * W_ih[gate*H+j, k]
    # built as I scalar*vector broadcast FMAs on the VPU (static unroll, no MXU).
    g = p_ref[n_in]                                   # (3, H) folded biases
    for k in range(n_in):                             # static unroll, I = 4
        g = g + x_ref[last_off + k] * p_ref[k]        # SMEM scalar * (3, H)

    rz = jax.nn.sigmoid(g[0:2, :])                    # fused: one EUP pass for r and z
    r = rz[0:1, :]
    z = rz[1:2, :]

    bhn = p_ref[n_in + 1]                             # (3, H); gate-n row holds b_hn
    n = jnp.tanh(g[2:3, :] + r * bhn[2:3, :])         # h0 = 0 => W_hn h + b_hn == b_hn

    out_ref[...] = (1.0 - z) * n                      # z*h term is exactly zero


def prepare_gru_params(params, hidden=HIDDEN):
    """One-time re-layout of torch.nn.GRU params into a single packed slab."""
    H = hidden
    wih = jnp.asarray(params["weight_ih"], jnp.float32)            # (3H, I), rows [r|z|n]
    i_sz = wih.shape[1]
    bih = jnp.asarray(params["bias_ih"], jnp.float32).reshape(3, H)
    bhh = jnp.asarray(params["bias_hh"], jnp.float32).reshape(3, H)
    # weight_hh is dead with h0 == 0 (its contribution is identically zero).

    w_g = wih.reshape(3, H, i_sz).transpose(2, 0, 1)                # (I, 3, H)
    b_fold = jnp.concatenate([bih[0:2] + bhh[0:2], bih[2:3]], 0)    # (3, H)
    bhn_row = jnp.zeros((3, H), jnp.float32).at[2].set(bhh[2])      # (3, H)

    slab = jnp.concatenate([w_g, b_fold[None], bhn_row[None]], 0)   # (I+2, 3, H)
    return slab


@jax.jit
def preprocess_intruders(int_observ, param_slab):
    """Reproduces PreProcessIntruders.forward: returns out[-1], shape (1, H)."""
    x = jnp.asarray(int_observ, jnp.float32)
    n_rows = x.shape[0]
    # Flatten (matches .view(N, 1, -1) with feature dim == 4); a contiguous
    # reshape is free under jit — no row-slice intermediate is materialized.
    x_flat = x.reshape(n_rows * INPUT)

    kernel = functools.partial(_gru_last_kernel, last_off=(n_rows - 1) * INPUT)

    return pl.pallas_call(
        kernel,
        out_shape=jax.ShapeDtypeStruct((1, HIDDEN), jnp.float32),
        in_specs=[
            pl.BlockSpec(memory_space=pltpu.MemorySpace.SMEM),   # x_flat (N*I,)
            pl.BlockSpec(memory_space=pltpu.MemorySpace.VMEM),   # packed slab (I+2, 3, H)
        ],
        out_specs=pl.BlockSpec(memory_space=pltpu.MemorySpace.VMEM),
    )(x_flat, param_slab)


def _reference_last_output(x_last, params, H=HIDDEN):
    """Pure-JAX torch.nn.GRU single step with h0 = 0, for correctness check."""
    wih = jnp.asarray(params["weight_ih"], jnp.float32)
    bih = jnp.asarray(params["bias_ih"], jnp.float32)
    bhh = jnp.asarray(params["bias_hh"], jnp.float32)
    gi = wih @ x_last + bih
    gh = bhh                                          # W_hh @ 0 + b_hh
    r = jax.nn.sigmoid(gi[0:H] + gh[0:H])
    z = jax.nn.sigmoid(gi[H:2 * H] + gh[H:2 * H])
    n = jnp.tanh(gi[2 * H:] + r * gh[2 * H:])
    return ((1.0 - z) * n)[None, :]


if __name__ == "__main__":
    key = jax.random.PRNGKey(0)
    k1, k2, k3, k4, k5 = jax.random.split(key, 5)

    bound = 0.5  # 1/sqrt(hidden_size=4), torch's uniform init range
    params = {
        "weight_ih": jax.random.uniform(k1, (3 * HIDDEN, INPUT), jnp.float32, -bound, bound),
        "weight_hh": jax.random.uniform(k2, (3 * HIDDEN, HIDDEN), jnp.float32, -bound, bound),  # unused (h0=0)
        "bias_ih":   jax.random.uniform(k3, (3 * HIDDEN,), jnp.float32, -bound, bound),
        "bias_hh":   jax.random.uniform(k4, (3 * HIDDEN,), jnp.float32, -bound, bound),
    }

    # 8 intruders, 4-dim observation each (GRU input_size = 4).
    int_observ = jax.random.normal(k5, (8, INPUT), dtype=jnp.float32)

    param_slab = prepare_gru_params(params)           # one-time prep (hoisted)

    out = preprocess_intruders(int_observ, param_slab)
    out = jax.block_until_ready(out)

    assert out.shape == (1, HIDDEN) and out.dtype == jnp.float32

    ref = _reference_last_output(int_observ.reshape(int_observ.shape[0], -1)[-1], params)
    assert jnp.allclose(out, ref, atol=1e-5, rtol=1e-5), (out, ref)

    print("KERNEL_OK")
</pallas_src>

<mosaic_0001>
module attributes {stable_mosaic.version = 11 : i64} {
  func.func @_gru_last_kernel(%arg0: memref<32xf32, #tpu.memory_space<smem>>, %arg1: memref<6x3x4xf32, #tpu.memory_space<vmem>>, %arg2: memref<1x4xf32, #tpu.memory_space<vmem>>) attributes {dimension_semantics = [], scalar_prefetch = 0 : i64, scratch_operands = 0 : i64, tpu.core_type = #tpu.core_type<tc>} {
    %c4 = arith.constant 4 : index
    %c0 = arith.constant 0 : index
    %c0_0 = arith.constant 0 : index
    %0 = vector.load %arg1[%c4, %c0, %c0_0] : memref<6x3x4xf32, #tpu.memory_space<vmem>>, vector<1x3x4xf32>
    %1 = vector.shape_cast %0 : vector<1x3x4xf32> to vector<3x4xf32>
    %c28 = arith.constant 28 : index
    %2 = memref.load %arg0[%c28] : memref<32xf32, #tpu.memory_space<smem>>
    %c0_1 = arith.constant 0 : index
    %c0_2 = arith.constant 0 : index
    %c0_3 = arith.constant 0 : index
    %3 = vector.load %arg1[%c0_1, %c0_2, %c0_3] : memref<6x3x4xf32, #tpu.memory_space<vmem>>, vector<1x3x4xf32>
    %4 = vector.shape_cast %3 : vector<1x3x4xf32> to vector<3x4xf32>
    %5 = vector.broadcast %2 : f32 to vector<3x4xf32>
    %6 = arith.mulf %5, %4 : vector<3x4xf32>
    %7 = arith.addf %1, %6 : vector<3x4xf32>
    %c29 = arith.constant 29 : index
    %8 = memref.load %arg0[%c29] : memref<32xf32, #tpu.memory_space<smem>>
    %c1 = arith.constant 1 : index
    %c0_4 = arith.constant 0 : index
    %c0_5 = arith.constant 0 : index
    %9 = vector.load %arg1[%c1, %c0_4, %c0_5] : memref<6x3x4xf32, #tpu.memory_space<vmem>>, vector<1x3x4xf32>
    %10 = vector.shape_cast %9 : vector<1x3x4xf32> to vector<3x4xf32>
    %11 = vector.broadcast %8 : f32 to vector<3x4xf32>
    %12 = arith.mulf %11, %10 : vector<3x4xf32>
    %13 = arith.addf %7, %12 : vector<3x4xf32>
    %c30 = arith.constant 30 : index
    %14 = memref.load %arg0[%c30] : memref<32xf32, #tpu.memory_space<smem>>
    %c2 = arith.constant 2 : index
    %c0_6 = arith.constant 0 : index
    %c0_7 = arith.constant 0 : index
    %15 = vector.load %arg1[%c2, %c0_6, %c0_7] : memref<6x3x4xf32, #tpu.memory_space<vmem>>, vector<1x3x4xf32>
    %16 = vector.shape_cast %15 : vector<1x3x4xf32> to vector<3x4xf32>
    %17 = vector.broadcast %14 : f32 to vector<3x4xf32>
    %18 = arith.mulf %17, %16 : vector<3x4xf32>
    %19 = arith.addf %13, %18 : vector<3x4xf32>
    %c31 = arith.constant 31 : index
    %20 = memref.load %arg0[%c31] : memref<32xf32, #tpu.memory_space<smem>>
    %c3 = arith.constant 3 : index
    %c0_8 = arith.constant 0 : index
    %c0_9 = arith.constant 0 : index
    %21 = vector.load %arg1[%c3, %c0_8, %c0_9] : memref<6x3x4xf32, #tpu.memory_space<vmem>>, vector<1x3x4xf32>
    %22 = vector.shape_cast %21 : vector<1x3x4xf32> to vector<3x4xf32>
    %23 = vector.broadcast %20 : f32 to vector<3x4xf32>
    %24 = arith.mulf %23, %22 : vector<3x4xf32>
    %25 = arith.addf %19, %24 : vector<3x4xf32>
    %26 = vector.extract_strided_slice %25 {offsets = [0, 0], sizes = [2, 4], strides = [1, 1]} : vector<3x4xf32> to vector<2x4xf32>
    %27 = arith.negf %26 : vector<2x4xf32>
    %28 = math.exp %27 : vector<2x4xf32>
    %cst = arith.constant 1.000000e+00 : f32
    %29 = vector.broadcast %cst : f32 to vector<2x4xf32>
    %30 = arith.addf %29, %28 : vector<2x4xf32>
    %31 = arith.divf %29, %30 : vector<2x4xf32>
    %32 = vector.extract_strided_slice %31 {offsets = [0, 0], sizes = [1, 4], strides = [1, 1]} : vector<2x4xf32> to vector<1x4xf32>
    %33 = vector.extract_strided_slice %31 {offsets = [1, 0], sizes = [1, 4], strides = [1, 1]} : vector<2x4xf32> to vector<1x4xf32>
    %c5 = arith.constant 5 : index
    %c0_10 = arith.constant 0 : index
    %c0_11 = arith.constant 0 : index
    %34 = vector.load %arg1[%c5, %c0_10, %c0_11] : memref<6x3x4xf32, #tpu.memory_space<vmem>>, vector<1x3x4xf32>
    %35 = vector.shape_cast %34 : vector<1x3x4xf32> to vector<3x4xf32>
    %36 = vector.extract_strided_slice %25 {offsets = [2, 0], sizes = [1, 4], strides = [1, 1]} : vector<3x4xf32> to vector<1x4xf32>
    %37 = vector.extract_strided_slice %35 {offsets = [2, 0], sizes = [1, 4], strides = [1, 1]} : vector<3x4xf32> to vector<1x4xf32>
    %38 = arith.mulf %32, %37 : vector<1x4xf32>
    %39 = arith.addf %36, %38 : vector<1x4xf32>
    %40 = math.tanh %39 : vector<1x4xf32>
    %cst_12 = arith.constant 1.000000e+00 : f32
    %41 = vector.broadcast %cst_12 : f32 to vector<1x4xf32>
    %42 = arith.subf %41, %33 : vector<1x4xf32>
    %43 = arith.mulf %42, %40 : vector<1x4xf32>
    %c0_13 = arith.constant 0 : index
    %c0_14 = arith.constant 0 : index
    %44 = vector.load %arg2[%c0_13, %c0_14] : memref<1x4xf32, #tpu.memory_space<vmem>>, vector<1x4xf32>
    tpu.vector_store %arg2[%c0_13, %c0_14], %43 {strides = array<i32>} : memref<1x4xf32, #tpu.memory_space<vmem>>, vector<1x4xf32>,
    return
  }
}

</mosaic_0001>

<bundles_post_ra>
// kernel: preprocess_intruders.1
= control target key start
LH: loop header
LB: loop body
LE: loop exit
PB: predicated region body
PF: predicated region fallthrough
CT: control target
= control target key end

     0   :  { %7 = vsyncpa [#allocation4], 0  ;;  %s195_s0 = inlined_call_operand.vmem [shape: f32[32], index: 0, kind: input, shape index: {}]   ;;  %s196_s1 = inlined_call_operand.vmem [shape: f32[6,3,4], index: 1, kind: input, shape index: {}]   ;;  %s197_s2 = inlined_call_operand.hbm [shape: f32[1,4], index: 2, kind: output, shape index: {}]  }
   0x1   :  { %8 = vsyncpa [#allocation3], 0  ;;  %s15_s11 = sshll.u32 %s195_s0, 4  ;;  %s16_s11 = int_to_ptr.vmem [resolvable:$true] %s15_s11 }
   0x2   :  { %s107_s12 = scalar_lea.vmem %s16_s11, 16  ;;  %p112_p1 = scmp.lt.s32.totalorder %s16_s11, %s16_s11 }
   0x3   :  { %p108_p0 = scmp.ne.s32.totalorder %s16_s11, %s107_s12  ;;  %p113_p2 = scmp.lt.s32.totalorder %s107_s12, %s107_s12 }
   0x5   :  { %p114_p3 = por %p113_p2, %p112_p1 }
   0x7   :  { %p115_p4 = pnand %p114_p3, %p108_p0 }
   0x9   :  { %118 = shalt.err (!%p115_p4)
}
   0xa   :  { %s145_s13 = smov [#allocation2]  }
   0xb   :  { %18 = dma.vmem_to_smem %s16_s11, 16, %s145_s13, [#allocation4]  }
   0xc   :  { %141 = dma.done.wait [#allocation4], 16  }
   0xd   :  { %142 = vsyncadd [#allocation4], 4294967280 }
   0xe   :  { %24 = sfence }
   0xf   :  { %s90_s14 = sld [smem:[#allocation2 + $0x1c]]  ;;  %s91_s15 = sld [smem:[#allocation2 + $0x1d]]  ;;  %v28_v0 = vld [vmem:[%s196_s1] sm:$0x7]  ;;  %v92_v1 = vld [vmem:[%s196_s1 + $0x4] sm:$0x7] }
  0x10   :  { %s93_s16 = sld [smem:[#allocation2 + $0x1e]]  ;;  %s95_s17 = sld [smem:[#allocation2 + $0x1f]]  ;;  %v89_v2 = vld [vmem:[%s196_s1 + $0x10] sm:$0x7]  ;;  %v94_v4 = vld [vmem:[%s196_s1 + $0x8] sm:$0x7] }
  0x11   :  { %v96_v9 = vld [vmem:[%s196_s1 + $0xc] sm:$0x7]  ;;  %v98_v20 = vld [vmem:[%s196_s1 + $0x14] sm:$0x7]  ;;  %s146_s29 = smov [#allocation5]   ;;  %vm72_vm0 = vcmask 25601  }
  0x12   :  { %v59_v21 = vrot.slane %v98_v20, 2  ;;  %s80_s30 = sshll.u32 %s146_s29, 4  ;;  %s81_s30 = int_to_ptr.vmem [resolvable:$true] %s80_s30 }
  0x13   :  { %s119_s3 = scalar_lea.vmem %s81_s30, 16  ;;  %s123_s4 = scalar_lea.vmem %s81_s30, 32 }
  0x14   :  { %p120_p5 = scmp.ne.s32.totalorder %s81_s30, %s119_s3  ;;  %p124_p6 = scmp.lt.s32.totalorder %s81_s30, %s81_s30 }
  0x15   :  { %v29_v3 = vstv %s90_s14  ;;  %v35_v6 = vstv %s91_s15  ;;  %p125_p7 = scmp.lt.s32.totalorder %s123_s4, %s119_s3 }
  0x16   :  { %v30_v5 = vmul.f32 %v29_v3, %v28_v0  ;;  %v41_v7 = vstv %s93_s16  ;;  %v36_v8 = vmul.f32 %v92_v1, %v35_v6  ;;  %v47_v10 = vstv %s95_s17 }
  0x17   :  { %v42_v12 = vmul.f32 %v94_v4, %v41_v7  ;;  %v48_v14 = vmul.f32 %v96_v9, %v47_v10  ;;  %p126_p8 = por %p125_p7, %p124_p6 }
  0x18   :  { %v31_v11 = vadd.f32 %v89_v2, %v30_v5 }
  0x19   :  { %p127_p9 = pnand %p126_p8, %p120_p5 }
  0x1a   :  { %v37_v13 = vadd.f32 %v36_v8, %v31_v11 }
  0x1c   :  { %v43_v15 = vadd.f32 %v42_v12, %v37_v13 }
  0x1e   :  { %v49_v16 = vadd.f32 %v48_v14, %v43_v15 }
  0x20   :  { %v97_v17 = vmul.f32 -1.442695, %v49_v16 }
  0x22   :  { %101 = vpow2.f32 %v97_v17 }
  0x2c   :  { %v102_v18 = vpop.eup %101 }
  0x2d   :  { %v53_v19 = vadd.f32 1.0, %v102_v18 }
  0x2f   :  { %103 = vrcp.f32 %v53_v19 }
  0x39   :  { %v104_v22 = vpop.eup %103 }
  0x3a   :  { %v61_v23 = vmul.f32 %v104_v22, %v59_v21  ;;  %v67_v26 = vsub.f32 1.0, %v104_v22 }
  0x3c   :  { %v63_v24 = vrot.slane %v61_v23, 6 }
  0x3e   :  { %v65_v25 = vadd.f32 %v63_v24, %v49_v16 }
  0x40   :  { %105 = vtanh.f32 %v65_v25 }
  0x4a   :  { %v106_v27 = vpop.eup %105 }
  0x4b   :  { %v69_v28 = vrot.slane %v106_v27, 1 }
  0x4d   :  { %v71_v29 = vmul.f32 %v69_v28, %v67_v26 }
  0x4f   :  { %73 = vst.msk [vmem:[#allocation5 - $0x1] sm:$0x2] %vm72_vm0, %v71_v29 }
  0x50   :  { %130 = shalt.err (!%p127_p9)
}
  0x51   :  { %s131_s6 = scalar_lea.hbm %s197_s2, 16 }
  0x52   :  { %p132_p10 = scmp.ne.s32.totalorder %s197_s2, %s131_s6  ;;  %p135_p11 = scmp.lt.u32.totalorder %s131_s6, %s197_s2 }
  0x54   :  { %p137_p12 = pnand %p135_p11, %p132_p10 }
  0x56   :  { %140 = shalt.err (!%p137_p12)
}
  0x57   :  { %83 = dma.vmem_to_hbm [thread:$0]  %s81_s30, 16, %s197_s2, [#allocation3]  }
  0x58   :  { %143 = dma.done.wait [#allocation3], 16  }
  0x59   :  { %144 = vsyncadd [#allocation3], 4294967280 }
  0x5a   :  { %87 = vsyncpa [#allocation3], 1 }
  0x5b   :  { %88 = vsyncpa [#allocation4], 1 }

</bundles_post_ra>
